<compile_context>
chip_gen: v5e
topology: v5e:2x2
jax: 0.10.0
libtpu: 0.0.40
codegen_flags: <defaults>
</compile_context>

<pallas_src>
import jax
import jax.numpy as jnp
from jax.experimental import pallas as pl
from jax.experimental.pallas import tpu as pltpu


def _round_up(v, m):
    return ((v + m - 1) // m) * m


def mlp_kernel(x_ref, w1_ref, b1_ref, w2_ref, b2_ref, o_ref):
    # In-kernel bf16 cast of the batch tile (VPU), so HBM only moves x once.
    x_bf = x_ref[...].astype(w1_ref.dtype)
    # hidden = relu(x @ W1 + b1): MXU matmul, f32 accumulation.
    h = jnp.dot(x_bf, w1_ref[...], preferred_element_type=jnp.float32)
    h = h + b1_ref[...]                      # (1, H) f32 bias broadcasts over rows
    a = jnp.maximum(h, 0.0)                  # ReLU epilogue in f32 on the VPU
    # out = a @ W2 + b2: activations cast to bf16 only for the MXU input.
    out = jnp.dot(a.astype(w2_ref.dtype), w2_ref[...],
                  preferred_element_type=jnp.float32)
    out = out + b2_ref[...]                  # (1, Np) f32 bias
    o_ref[...] = out.astype(o_ref.dtype)     # bf16 store (lane-dense, 128 wide)


def prepare_mlp_params(w1, b1, w2, b2, *, compute_dtype=jnp.bfloat16):
    """One-time weight prep: bf16 cast + pad the 10-wide output to 128 lanes.

    Do this once and reuse across forward calls (it is pure per-call overhead
    otherwise).
    """
    K, H = w1.shape
    N = w2.shape[1]
    Np = _round_up(N, 128)                   # 10 -> 128: unmasked output stores
    f32 = jnp.float32

    w1c = w1.astype(compute_dtype)                              # (784, 256), no K pad
    b1c = b1.astype(f32).reshape(1, H)                          # (1, 256) f32
    w2p = jnp.zeros((H, Np), compute_dtype).at[:, :N].set(w2.astype(compute_dtype))
    b2p = jnp.zeros((1, Np), f32).at[:, :N].set(b2.astype(f32).reshape(1, N))
    return (w1c, b1c, w2p, b2p, N)


def mlp_forward(x, prepared):
    """Fused MLP forward: relu(x @ w1 + b1) @ w2 + b2.

    x: (B, 784) f32 (or bf16); `prepared` comes from prepare_mlp_params().
    """
    w1c, b1c, w2p, b2p, n_out = prepared
    B, K = x.shape
    H = w1c.shape[1]
    Np = w2p.shape[1]

    # Batch tiling: no host-side batch padding.
    #  - B <= 256: one full-array block (legal regardless of divisibility).
    #  - larger B: 256/512-row tiles, keeping >= 2 grid tiles so the "parallel"
    #    batch axis can be split across v7x's two TensorCores; Pallas handles
    #    the ragged last tile (rows are independent, garbage rows are masked).
    if B <= 256:
        TM = B
    elif B < 1024:
        TM = 256
    else:
        TM = 512
    grid = (pl.cdiv(B, TM),)

    x_bytes = jnp.dtype(x.dtype).itemsize
    w_bytes = jnp.dtype(w1c.dtype).itemsize
    cost = pl.CostEstimate(
        flops=2 * B * (K * H + H * Np),
        transcendentals=0,
        bytes_accessed=(B * K * x_bytes          # x read (once)
                        + K * H * w_bytes        # W1
                        + H * Np * w_bytes       # W2
                        + (H + Np) * 4           # biases (f32)
                        + B * Np * 2),           # bf16 output writeback
    )

    out_padded = pl.pallas_call(
        mlp_kernel,
        out_shape=jax.ShapeDtypeStruct((B, Np), jnp.bfloat16),
        grid=grid,
        in_specs=[
            pl.BlockSpec((TM, K), lambda i: (i, 0)),   # batch tile of x (f32, unpadded)
            pl.BlockSpec((K, H), lambda i: (0, 0)),    # W1 resident across batch loop
            pl.BlockSpec((1, H), lambda i: (0, 0)),    # b1 resident
            pl.BlockSpec((H, Np), lambda i: (0, 0)),   # W2 resident
            pl.BlockSpec((1, Np), lambda i: (0, 0)),   # b2 resident
        ],
        out_specs=pl.BlockSpec((TM, Np), lambda i: (i, 0)),
        compiler_params=pltpu.CompilerParams(
            dimension_semantics=("parallel",),         # shard batch tiles across TCs
            vmem_limit_bytes=32 * 1024 * 1024,         # headroom vs v5e's 16 MiB default
        ),
        cost_estimate=cost,
    )(x, w1c, b1c, w2p, b2p)

    # Strip the output-feature padding; upcast the bf16 result.
    return out_padded[:, :n_out].astype(x.dtype)


def init_params(key, in_features=784, hidden=256, out_features=10, dtype=jnp.float32):
    # Mimics PyTorch nn.Linear init: U(-1/sqrt(fan_in), 1/sqrt(fan_in)).
    k1, k2, k3, k4 = jax.random.split(key, 4)
    bound1 = 1.0 / (in_features ** 0.5)
    bound2 = 1.0 / (hidden ** 0.5)
    # Stored as [in, out] (transpose of PyTorch's [out, in]) for x @ W.
    w1 = jax.random.uniform(k1, (in_features, hidden), dtype, -bound1, bound1)
    b1 = jax.random.uniform(k2, (1, hidden), dtype, -bound1, bound1)
    w2 = jax.random.uniform(k3, (hidden, out_features), dtype, -bound2, bound2)
    b2 = jax.random.uniform(k4, (1, out_features), dtype, -bound2, bound2)
    return w1, b1, w2, b2


if __name__ == "__main__":
    key = jax.random.PRNGKey(0)
    kx, kp, kx2 = jax.random.split(key, 3)

    w1, b1, w2, b2 = init_params(kp)
    prepared = prepare_mlp_params(w1, b1, w2, b2)   # one-time weight prep

    def ref_fn(x):
        return jnp.maximum(x @ w1 + b1, 0.0) @ w2 + b2

    # --- Small batch (spec-sized): single full-array block -------------------
    B, D_IN = 2, 784
    x = jax.random.normal(kx, (B, D_IN), dtype=jnp.float32)
    out = jax.block_until_ready(mlp_forward(x, prepared))
    assert out.shape == (B, 10)
    # bf16 MXU inputs + bf16 output store vs f32 reference -> loose tolerance.
    assert jnp.allclose(out, ref_fn(x), atol=2e-2, rtol=2e-2)

    # --- Larger batch exercises the multi-tile (parallel) grid path ----------
    B2 = 512
    x2 = jax.random.normal(kx2, (B2, D_IN), dtype=jnp.float32)
    out2 = jax.block_until_ready(mlp_forward(x2, prepared))
    assert out2.shape == (B2, 10)
    assert jnp.allclose(out2, ref_fn(x2), atol=2e-2, rtol=2e-2)

    print("KERNEL_OK")
</pallas_src>

<mosaic_0001>
module attributes {stable_mosaic.version = 11 : i64} {
  func.func @mlp_kernel(%arg0: i32, %arg1: memref<2x784xf32, #tpu.memory_space<vmem>>, %arg2: memref<784x256xbf16, #tpu.memory_space<vmem>>, %arg3: memref<1x256xf32, #tpu.memory_space<vmem>>, %arg4: memref<256x128xbf16, #tpu.memory_space<vmem>>, %arg5: memref<1x128xf32, #tpu.memory_space<vmem>>, %arg6: memref<2x128xbf16, #tpu.memory_space<vmem>>) attributes {dimension_semantics = [#tpu.dimension_semantics<parallel>], iteration_bounds = array<i64: 1>, scalar_prefetch = 0 : i64, scratch_operands = 0 : i64, tpu.core_type = #tpu.core_type<tc>, window_params = [{transform_indices = @transform_0, window_bounds = array<i64: 2, 784>}, {pipeline_mode = #tpu.pipeline_mode<synchronous>, transform_indices = @transform_1, window_bounds = array<i64: 784, 256>}, {pipeline_mode = #tpu.pipeline_mode<synchronous>, transform_indices = @transform_2, window_bounds = array<i64: 1, 256>}, {pipeline_mode = #tpu.pipeline_mode<synchronous>, transform_indices = @transform_3, window_bounds = array<i64: 256, 128>}, {pipeline_mode = #tpu.pipeline_mode<synchronous>, transform_indices = @transform_4, window_bounds = array<i64: 1, 128>}, {transform_indices = @transform_5, window_bounds = array<i64: 2, 128>}]} {
    %c0 = arith.constant 0 : index
    %c0_0 = arith.constant 0 : index
    %0 = vector.load %arg1[%c0, %c0_0] : memref<2x784xf32, #tpu.memory_space<vmem>>, vector<2x784xf32>
    %1 = arith.truncf %0 : vector<2x784xf32> to vector<2x784xbf16>
    %c0_1 = arith.constant 0 : index
    %c0_2 = arith.constant 0 : index
    %2 = vector.load %arg2[%c0_1, %c0_2] : memref<784x256xbf16, #tpu.memory_space<vmem>>, vector<784x256xbf16>
    %cst = arith.constant dense<0.000000e+00> : vector<2x256xf32>
    %3 = tpu.matmul %1, %2, %cst {dimension_numbers = #tpu.dot_dimension_numbers<[1], [0], [0], [1], [0, 0, 1, 1], [], []>} : vector<2x784xbf16>, vector<784x256xbf16>, vector<2x256xf32> -> vector<2x256xf32>
    %c0_3 = arith.constant 0 : index
    %c0_4 = arith.constant 0 : index
    %4 = vector.load %arg3[%c0_3, %c0_4] : memref<1x256xf32, #tpu.memory_space<vmem>>, vector<1x256xf32>
    %5 = vector.broadcast %4 : vector<1x256xf32> to vector<2x256xf32>
    %6 = arith.addf %3, %5 : vector<2x256xf32>
    %cst_5 = arith.constant 0.000000e+00 : f32
    %7 = vector.broadcast %cst_5 : f32 to vector<2x256xf32>
    %8 = arith.maximumf %6, %7 : vector<2x256xf32>
    %9 = arith.truncf %8 : vector<2x256xf32> to vector<2x256xbf16>
    %c0_6 = arith.constant 0 : index
    %c0_7 = arith.constant 0 : index
    %10 = vector.load %arg4[%c0_6, %c0_7] : memref<256x128xbf16, #tpu.memory_space<vmem>>, vector<256x128xbf16>
    %cst_8 = arith.constant dense<0.000000e+00> : vector<2x128xf32>
    %11 = tpu.matmul %9, %10, %cst_8 {dimension_numbers = #tpu.dot_dimension_numbers<[1], [0], [0], [1], [0, 0, 1, 1], [], []>} : vector<2x256xbf16>, vector<256x128xbf16>, vector<2x128xf32> -> vector<2x128xf32>
    %c0_9 = arith.constant 0 : index
    %c0_10 = arith.constant 0 : index
    %12 = vector.load %arg5[%c0_9, %c0_10] : memref<1x128xf32, #tpu.memory_space<vmem>>, vector<1x128xf32>
    %13 = vector.broadcast %12 : vector<1x128xf32> to vector<2x128xf32>
    %14 = arith.addf %11, %13 : vector<2x128xf32>
    %15 = arith.truncf %14 : vector<2x128xf32> to vector<2x128xbf16>
    %c0_11 = arith.constant 0 : index
    %c0_12 = arith.constant 0 : index
    %16 = vector.load %arg6[%c0_11, %c0_12] : memref<2x128xbf16, #tpu.memory_space<vmem>>, vector<2x128xbf16>
    tpu.vector_store %arg6[%c0_11, %c0_12], %15 {strides = array<i32>} : memref<2x128xbf16, #tpu.memory_space<vmem>>, vector<2x128xbf16>,
    return
  }
  func.func @transform_0(%arg0: i32) -> (i32, i32) {
    %c0_i32 = arith.constant 0 : i32
    %c0_i32_0 = arith.constant 0 : i32
    return %arg0, %c0_i32 : i32, i32
  }
  func.func @transform_1(%arg0: i32) -> (i32, i32) {
    %c0_i32 = arith.constant 0 : i32
    %c0_i32_0 = arith.constant 0 : i32
    %c0_i32_1 = arith.constant 0 : i32
    return %c0_i32, %c0_i32_0 : i32, i32
  }
  func.func @transform_2(%arg0: i32) -> (i32, i32) {
    %c0_i32 = arith.constant 0 : i32
    %c0_i32_0 = arith.constant 0 : i32
    %c0_i32_1 = arith.constant 0 : i32
    return %c0_i32, %c0_i32_0 : i32, i32
  }
  func.func @transform_3(%arg0: i32) -> (i32, i32) {
    %c0_i32 = arith.constant 0 : i32
    %c0_i32_0 = arith.constant 0 : i32
    %c0_i32_1 = arith.constant 0 : i32
    return %c0_i32, %c0_i32_0 : i32, i32
  }
  func.func @transform_4(%arg0: i32) -> (i32, i32) {
    %c0_i32 = arith.constant 0 : i32
    %c0_i32_0 = arith.constant 0 : i32
    %c0_i32_1 = arith.constant 0 : i32
    return %c0_i32, %c0_i32_0 : i32, i32
  }
  func.func @transform_5(%arg0: i32) -> (i32, i32) {
    %c0_i32 = arith.constant 0 : i32
    %c0_i32_0 = arith.constant 0 : i32
    return %arg0, %c0_i32 : i32, i32
  }
}

</mosaic_0001>

<bundles_post_ra>
// kernel: tpu_custom_call.1
= control target key start
LH: loop header
LB: loop body
LE: loop exit
PB: predicated region body
PF: predicated region fallthrough
CT: control target
= control target key end

     0   :  { %10 = vsyncpa [#allocation3], 0  ;;  %s1869_s0 = inlined_call_operand.hbm [shape: f32[2,784], index: 0, kind: input, shape index: {}]   ;;  %s1870_s1 = inlined_call_operand.hbm [shape: bf16[784,256], index: 1, kind: input, shape index: {}]   ;;  %s1871_s2 = inlined_call_operand.hbm [shape: f32[1,256], index: 2, kind: input, shape index: {}]   ;;  %s1872_s3 = inlined_call_operand.hbm [shape: bf16[256,128], index: 3, kind: input, shape index: {}]   ;;  %s1873_s4 = inlined_call_operand.vmem [shape: f32[1,128], index: 4, kind: input, shape index: {}]   ;;  %s1874_s5 = inlined_call_operand.hbm [shape: bf16[2,128], index: 5, kind: output, shape index: {}]  }
   0x1   :  { %11 = vsyncpa [#allocation6], 0 }
   0x2   :  { %12 = vsyncpa [#allocation9], 0  ;;  %s29_s20 = sshll.u32 %s1870_s1, 4  ;;  %s30_s20 = int_to_ptr.hbm [resolvable:$true] %s29_s20 }
   0x3   :  { %13 = vsyncpa [#allocation4], 0  ;;  %s1782_s21 = smov [#allocation5]   ;;  %s19_s25 = sshll.u32 %s1869_s0, 4  ;;  %s20_s25 = int_to_ptr.hbm [resolvable:$true] %s19_s25 }
   0x4   :  { %s31_s22 = sshll.u32 %s1782_s21, 4  ;;  %s1783_s26 = smov 128   ;;  %s32_s22 = int_to_ptr.vmem [resolvable:$true] %s31_s22 }
   0x5   :  { %s1784_s27 = smov 8   ;;  %s1785_s28 = smov [#allocation2]  }
   0x6   :  { %37 = dma.hbm_to_vmem [thread:$0]  %s30_s20, 12544, %s32_s22, [#allocation6], %s1783_s26, %s1783_s26, %s1784_s27  }
   0x7   :  { %s21_s29 = sshll.u32 %s1785_s28, 4  ;;  %s43_s7 = sshll.u32 %s1871_s2, 4  ;;  %s22_s29 = int_to_ptr.vmem [resolvable:$true] %s21_s29  ;;  %s44_s7 = int_to_ptr.hbm [resolvable:$true] %s43_s7 }
   0x8   :  { %24 = dma.hbm_to_vmem [thread:$0]  %s20_s25, 224, %s22_s29, [#allocation3]  }
   0x9   :  { %s53_s9 = sshll.u32 %s1872_s3, 4  ;;  %s1786_s10 = smov [#allocation7]   ;;  %s54_s9 = int_to_ptr.hbm [resolvable:$true] %s53_s9 }
   0xa   :  { %s45_s11 = sshll.u32 %s1786_s10, 4  ;;  %s1787_s0 = smov [#allocation8]   ;;  %s46_s11 = int_to_ptr.vmem [resolvable:$true] %s45_s11 }
   0xb   :  { %48 = dma.hbm_to_vmem [thread:$0]  %s44_s7, 32, %s46_s11, [#allocation6]  }
   0xc   :  { %s55_s12 = sshll.u32 %s1787_s0, 4  ;;  %s1788_s13 = smov 64   ;;  %s56_s12 = int_to_ptr.vmem [resolvable:$true] %s55_s12 }
   0xd   :  { %s1789_s14 = smov 4  }
   0xe   :  { %61 = dma.hbm_to_vmem [thread:$0]  %s54_s9, 2048, %s56_s12, [#allocation9], %s1788_s13, %s1788_s13, %s1789_s14  }
   0xf   :  { %1774 = dma.done.wait [#allocation3], 224  }
  0x10   :  { %1775 = vsyncadd [#allocation3], 4294967072 }
  0x11   :  { %1776 = dma.done.wait [#allocation6], 12576  }
  0x12   :  { %1777 = vsyncadd [#allocation6], 4294954720 }
  0x13   :  { %1778 = dma.done.wait [#allocation9], 2048  }
  0x14   :  { %1779 = vsyncadd [#allocation9], 4294965248  ;;  %v1130_v0 = vld [vmem:[#allocation5 + $0x70] sm:$0xf]  ;;  %v1545_v1 = vld [vmem:[#allocation5 + $0x74] sm:$0xf0] }
  0x15   :  { %v1258_v2 = vld [vmem:[#allocation5 + $0x170] sm:$0xf]  ;;  %v1131_v3 = vor.u32 %v1545_v1, %v1130_v0  ;;  %v1577_v4 = vld [vmem:[#allocation5 + $0x174] sm:$0xf0]  ;;  %v1122_v11 = vld [vmem:[#allocation5 + $0x60] sm:$0xf] }
  0x16   :  { %v1322_v5 = vld [vmem:[#allocation5 + $0x1f0] sm:$0xf]  ;;  %v1593_v6 = vld [vmem:[#allocation5 + $0x1f4] sm:$0xf0]  ;;  %v1259_v7 = vor.u32 %v1577_v4, %v1258_v2  ;;  %v1543_v13 = vld [vmem:[#allocation5 + $0x64] sm:$0xf0] }
  0x17   :  { %v1323_v8 = vor.u32 %v1593_v6, %v1322_v5  ;;  %v1194_v9 = vld [vmem:[#allocation5 + $0xf0] sm:$0xf]  ;;  %v1561_v10 = vld [vmem:[#allocation5 + $0xf4] sm:$0xf0]  ;;  %707 = vmatpush.bf16.msra.mxu0 %v1131_v3  ;;  %v1250_v14 = vld [vmem:[#allocation5 + $0x160] sm:$0xf]  ;;  %v1123_v16 = vor.u32 %v1543_v13, %v1122_v11 }
  0x18   :  { %v1195_v12 = vor.u32 %v1561_v10, %v1194_v9  ;;  %v1575_v15 = vld [vmem:[#allocation5 + $0x164] sm:$0xf0]  ;;  %733 = vmatpush.bf16.msra.mxu2 %v1259_v7  ;;  %v1314_v18 = vld [vmem:[#allocation5 + $0x1e0] sm:$0xf]  ;;  %v1114_v23 = vld [vmem:[#allocation5 + $0x50] sm:$0xf] }
  0x19   :  { %746 = vmatpush.bf16.msra.mxu3 %v1323_v8  ;;  %v1251_v17 = vor.u32 %v1575_v15, %v1250_v14  ;;  %v1591_v19 = vld [vmem:[#allocation5 + $0x1e4] sm:$0xf0]  ;;  %v1186_v20 = vld [vmem:[#allocation5 + $0xe0] sm:$0xf]  ;;  %v1541_v24 = vld [vmem:[#allocation5 + $0x54] sm:$0xf0] }
  0x1a   :  { %720 = vmatpush.bf16.msra.mxu1 %v1195_v12  ;;  %v1315_v21 = vor.u32 %v1591_v19, %v1314_v18  ;;  %v1559_v22 = vld [vmem:[#allocation5 + $0xe4] sm:$0xf0]  ;;  %v1242_v26 = vld [vmem:[#allocation5 + $0x150] sm:$0xf]  ;;  %v1573_v27 = vld [vmem:[#allocation5 + $0x154] sm:$0xf0]  ;;  %v1115_v29 = vor.u32 %v1541_v24, %v1114_v23 }
  0x1b   :  { %v1187_v25 = vor.u32 %v1559_v22, %v1186_v20  ;;  %v1306_v28 = vld [vmem:[#allocation5 + $0x1d0] sm:$0xf]  ;;  %708 = vmatpush.bf16.msra.mxu0 %v1123_v16  ;;  %v1589_v30 = vld [vmem:[#allocation5 + $0x1d4] sm:$0xf0]  ;;  %v1243_v33 = vor.u32 %v1573_v27, %v1242_v26  ;;  %v1106_v35 = vld [vmem:[#allocation5 + $0x40] sm:$0xf] }
  0x1c   :  { %v1178_v31 = vld [vmem:[#allocation5 + $0xd0] sm:$0xf]  ;;  %v1557_v32 = vld [vmem:[#allocation5 + $0xd4] sm:$0xf0]  ;;  %734 = vmatpush.bf16.msra.mxu2 %v1251_v17  ;;  %v1307_v34 = vor.u32 %v1589_v30, %v1306_v28  ;;  %v1539_v36 = vld [vmem:[#allocation5 + $0x44] sm:$0xf0] }
  0x1d   :  { %747 = vmatpush.bf16.msra.mxu3 %v1315_v21  ;;  %v1234_v37 = vld [vmem:[#allocation5 + $0x140] sm:$0xf]  ;;  %v1179_v38 = vor.u32 %v1557_v32, %v1178_v31  ;;  %v1571_v39 = vld [vmem:[#allocation5 + $0x144] sm:$0xf0]  ;;  %v1107_v44 = vor.u32 %v1539_v36, %v1106_v35  ;;  %v1098_v47 = vld [vmem:[#allocation5 + $0x30] sm:$0xf] }
  0x1e   :  { %721 = vmatpush.bf16.msra.mxu1 %v1187_v25  ;;  %v1298_v40 = vld [vmem:[#allocation5 + $0x1c0] sm:$0xf]  ;;  %v1587_v41 = vld [vmem:[#allocation5 + $0x1c4] sm:$0xf0]  ;;  %v1235_v45 = vor.u32 %v1571_v39, %v1234_v37  ;;  %v1537_v48 = vld [vmem:[#allocation5 + $0x34] sm:$0xf0] }
  0x1f   :  { %v1170_v42 = vld [vmem:[#allocation5 + $0xc0] sm:$0xf]  ;;  %v1555_v43 = vld [vmem:[#allocation5 + $0xc4] sm:$0xf0]  ;;  %709 = vmatpush.bf16.msra.mxu0 %v1115_v29  ;;  %v1299_v46 = vor.u32 %v1587_v41, %v1298_v40  ;;  %v1226_v49 = vld [vmem:[#allocation5 + $0x130] sm:$0xf]  ;;  %v1099_v56 = vor.u32 %v1537_v48, %v1098_v47 }
  0x20   :  { %735 = vmatpush.bf16.msra.mxu2 %v1243_v33  ;;  %v1171_v50 = vor.u32 %v1555_v43, %v1170_v42  ;;  %v1569_v51 = vld [vmem:[#allocation5 + $0x134] sm:$0xf0]  ;;  %v1290_v52 = vld [vmem:[#allocation5 + $0x1b0] sm:$0xf]  ;;  %v1090_v59 = vld [vmem:[#allocation5 + $0x20] sm:$0xf] }
  0x21   :  { %748 = vmatpush.bf16.msra.mxu3 %v1307_v34  ;;  %v1585_v53 = vld [vmem:[#allocation5 + $0x1b4] sm:$0xf0]  ;;  %v1162_v54 = vld [vmem:[#allocation5 + $0xb0] sm:$0xf]  ;;  %v1227_v57 = vor.u32 %v1569_v51, %v1226_v49  ;;  %v1535_v60 = vld [vmem:[#allocation5 + $0x24] sm:$0xf0] }
  0x22   :  { %722 = vmatpush.bf16.msra.mxu1 %v1179_v38  ;;  %v1553_v55 = vld [vmem:[#allocation5 + $0xb4] sm:$0xf0]  ;;  %v1291_v58 = vor.u32 %v1585_v53, %v1290_v52  ;;  %v1218_v61 = vld [vmem:[#allocation5 + $0x120] sm:$0xf]  ;;  %v1567_v63 = vld [vmem:[#allocation5 + $0x124] sm:$0xf0]  ;;  %v1091_v4 = vor.u32 %v1535_v60, %v1090_v59 }
  0x23   :  { %710 = vmatpush.bf16.msra.mxu0 %v1107_v44  ;;  %v1163_v62 = vor.u32 %v1553_v55, %v1162_v54  ;;  %v1282_v0 = vld [vmem:[#allocation5 + $0x1a0] sm:$0xf]  ;;  %v1583_v1 = vld [vmem:[#allocation5 + $0x1a4] sm:$0xf0]  ;;  %v1082_v5 = vld [vmem:[#allocation5 + $0x10] sm:$0xf]  ;;  %v1219_v7 = vor.u32 %v1567_v63, %v1218_v61 }
  0x24   :  { %736 = vmatpush.bf16.msra.mxu2 %v1235_v45  ;;  %v1154_v2 = vld [vmem:[#allocation5 + $0xa0] sm:$0xf]  ;;  %v1551_v3 = vld [vmem:[#allocation5 + $0xa4] sm:$0xf0]  ;;  %v1533_v6 = vld [vmem:[#allocation5 + $0x14] sm:$0xf0]  ;;  %v1283_v8 = vor.u32 %v1583_v1, %v1282_v0 }
  0x25   :  { %749 = vmatpush.bf16.msra.mxu3 %v1299_v46  ;;  %v1210_v9 = vld [vmem:[#allocation5 + $0x110] sm:$0xf]  ;;  %v1565_v10 = vld [vmem:[#allocation5 + $0x114] sm:$0xf0]  ;;  %v1155_v12 = vor.u32 %v1551_v3, %v1154_v2  ;;  %v1074_v16 = vld [vmem:[#allocation5] sm:$0xf]  ;;  %v1083_v19 = vor.u32 %v1533_v6, %v1082_v5 }
  0x26   :  { %723 = vmatpush.bf16.msra.mxu1 %v1171_v50  ;;  %v1274_v11 = vld [vmem:[#allocation5 + $0x190] sm:$0xf]  ;;  %v1581_v13 = vld [vmem:[#allocation5 + $0x194] sm:$0xf0]  ;;  %v1531_v17 = vld [vmem:[#allocation5 + $0x4] sm:$0xf0]  ;;  %v1211_v22 = vor.u32 %v1565_v10, %v1210_v9 }
  0x27   :  { %711 = vmatpush.bf16.msra.mxu0 %v1099_v56  ;;  %v1146_v14 = vld [vmem:[#allocation5 + $0x90] sm:$0xf]  ;;  %v1549_v15 = vld [vmem:[#allocation5 + $0x94] sm:$0xf0]  ;;  %v1202_v20 = vld [vmem:[#allocation5 + $0x100] sm:$0xf]  ;;  %v1275_v23 = vor.u32 %v1581_v13, %v1274_v11  ;;  %v1075_v34 = vor.u32 %v1531_v17, %v1074_v16 }
  0x28   :  { %737 = vmatpush.bf16.msra.mxu2 %v1227_v57  ;;  %v81_v18 = vld [vmem:[#allocation2] sm:$0xff]  ;;  %v1563_v21 = vld [vmem:[#allocation5 + $0x104] sm:$0xf0]  ;;  %v1266_v24 = vld [vmem:[#allocation5 + $0x180] sm:$0xf]  ;;  %v1147_v27 = vor.u32 %v1549_v15, %v1146_v14  ;;  %vm703_vm0 = vcmask 130048  }
  0x29   :  { %750 = vmatpush.bf16.msra.mxu3 %v1291_v58  ;;  %85 = vst [vmem:[#allocation1] ss:$4 sm:$0xff] %v81_v18  ;;  %v1579_v25 = vld [vmem:[#allocation5 + $0x184] sm:$0xf0]  ;;  %v1386_v26 = vld [vmem:[#allocation5 + $0x270] sm:$0xf]  ;;  %v1203_v38 = vor.u32 %v1563_v21, %v1202_v20 }
  0x2a   :  { %724 = vmatpush.bf16.msra.mxu1 %v1163_v62  ;;  %v1609_v28 = vld [vmem:[#allocation5 + $0x274] sm:$0xf0]  ;;  %v1544_v29 = vld [vmem:[#allocation5 + $0x74] sm:$0xf]  ;;  %v1132_v30 = vld [vmem:[#allocation5 + $0x78] sm:$0xf0]  ;;  %v1267_v39 = vor.u32 %v1579_v25, %v1266_v24 }
  0x2b   :  { %712 = vmatpush.bf16.msra.mxu0 %v1091_v4  ;;  %v1138_v31 = vld [vmem:[#allocation5 + $0x80] sm:$0xf]  ;;  %v1547_v32 = vld [vmem:[#allocation5 + $0x84] sm:$0xf0]  ;;  %v1450_v33 = vld [vmem:[#allocation5 + $0x2f0] sm:$0xf]  ;;  %v1387_v43 = vor.u32 %v1609_v28, %v1386_v26  ;;  %v1135_v44 = vor.u32 %v1544_v29, %v1132_v30 }
  0x2c   :  { %738 = vmatpush.bf16.msra.mxu2 %v1219_v7  ;;  %v1625_v35 = vld [vmem:[#allocation5 + $0x2f4] sm:$0xf0]  ;;  %v1458_v36 = vld [vmem:[#allocation5 + $0x300] sm:$0xf]  ;;  %v1627_v37 = vld [vmem:[#allocation5 + $0x304] sm:$0xf0]  ;;  %v1139_v48 = vor.u32 %v1547_v32, %v1138_v31 }
  0x2d   :  { %751 = vmatpush.bf16.msra.mxu3 %v1283_v8  ;;  %v1560_v40 = vld [vmem:[#allocation5 + $0xf4] sm:$0xf]  ;;  %v1196_v41 = vld [vmem:[#allocation5 + $0xf8] sm:$0xf0]  ;;  %v1378_v42 = vld [vmem:[#allocation5 + $0x260] sm:$0xf]  ;;  %v1459_v50 = vor.u32 %v1627_v37, %v1458_v36  ;;  %v1451_v53 = vor.u32 %v1625_v35, %v1450_v33 }
  0x2e   :  { %725 = vmatpush.bf16.msra.mxu1 %v1155_v12  ;;  %v1607_v45 = vld [vmem:[#allocation5 + $0x264] sm:$0xf0]  ;;  %v1542_v46 = vld [vmem:[#allocation5 + $0x64] sm:$0xf]  ;;  %v1124_v47 = vld [vmem:[#allocation5 + $0x68] sm:$0xf0]  ;;  %v1199_v56 = vor.u32 %v1560_v40, %v1196_v41 }
  0x2f   :  { %713 = vmatpush.bf16.msra.mxu0 %v1083_v19  ;;  %v1442_v54 = vld [vmem:[#allocation5 + $0x2e0] sm:$0xf]  ;;  %v1623_v57 = vld [vmem:[#allocation5 + $0x2e4] sm:$0xf0]  ;;  %v1379_v60 = vor.u32 %v1607_v45, %v1378_v42  ;;  %v1127_v61 = vor.u32 %v1542_v46, %v1124_v47  ;;  %v1558_v62 = vld [vmem:[#allocation5 + $0xe4] sm:$0xf] }
  0x30   :  { %739 = vmatpush.bf16.msra.mxu2 %v1211_v22  ;;  %v90_v49 = vld.sshfl [vmem:[#allocation1 + $0x10] sm:$0xff pattern:$0x73625140]  ;;  %v88_v51 = vld.sshfl [vmem:[#allocation1] sm:$0xff pattern:$0x73625140]  ;;  %v1443_v6 = vor.u32 %v1623_v57, %v1442_v54 }
  0x31   :  { %752 = vmatpush.bf16.msra.mxu3 %v1275_v23  ;;  %v1833_v52 = vpack.c.bf16 %v90_v49, %v90_v49  ;;  %v91_v55 = vld.sshfl [vmem:[#allocation1 + $0x18] sm:$0xff pattern:$0x73625140]  ;;  %v1835_v58 = vpack.c.bf16 %v88_v51, %v88_v51  ;;  %v89_v59 = vld.sshfl [vmem:[#allocation1 + $0x8] sm:$0xff pattern:$0x73625140] }
  0x32   :  { %726 = vmatpush.bf16.msra.mxu1 %v1147_v27  ;;  %v1188_v63 = vld [vmem:[#allocation5 + $0xe8] sm:$0xf0]  ;;  %v1370_v0 = vld [vmem:[#allocation5 + $0x250] sm:$0xf]  ;;  %v1605_v1 = vld [vmem:[#allocation5 + $0x254] sm:$0xf0]  ;;  %v1837_v4 = vpack.c.bf16 %v91_v55, %v91_v55  ;;  %v1839_v5 = vpack.c.bf16 %v89_v59, %v89_v59 }
  0x33   :  { %714 = vmatpush.bf16.msra.mxu0 %v1075_v34  ;;  %v1540_v2 = vld [vmem:[#allocation5 + $0x54] sm:$0xf]  ;;  %v1116_v3 = vld [vmem:[#allocation5 + $0x58] sm:$0xf0]  ;;  %v1191_v7 = vor.u32 %v1558_v62, %v1188_v63  ;;  %v1434_v8 = vld [vmem:[#allocation5 + $0x2d0] sm:$0xf]  ;;  %v1371_v10 = vor.u32 %v1605_v1, %v1370_v0 }
  0x34   :  { %740 = vmatpush.bf16.msra.mxu2 %v1203_v38  ;;  %v1621_v9 = vld [vmem:[#allocation5 + $0x2d4] sm:$0xf0]  ;;  %v1119_v11 = vor.u32 %v1540_v2, %v1116_v3  ;;  %v1556_v12 = vld [vmem:[#allocation5 + $0xd4] sm:$0xf]  ;;  %v1180_v13 = vld [vmem:[#allocation5 + $0xd8] sm:$0xf0] }
  0x35   :  { %753 = vmatpush.bf16.msra.mxu3 %v1267_v39  ;;  %v1362_v14 = vld [vmem:[#allocation5 + $0x240] sm:$0xf]  ;;  %v1603_v15 = vld [vmem:[#allocation5 + $0x244] sm:$0xf0]  ;;  %v1538_v16 = vld [vmem:[#allocation5 + $0x44] sm:$0xf]  ;;  %v1435_v18 = vor.u32 %v1621_v9, %v1434_v8  ;;  %v1183_v19 = vor.u32 %v1556_v12, %v1180_v13 }
  0x36   :  { %727 = vmatpush.bf16.msra.mxu1 %v1139_v48  ;;  %715 = vmatmul.bf16.vlgmr.msra.gmra.mxu0 %v1835_v58  ;;  %v1108_v17 = vld [vmem:[#allocation5 + $0x48] sm:$0xf0]  ;;  %v1426_v20 = vld [vmem:[#allocation5 + $0x2c0] sm:$0xf]  ;;  %v1619_v21 = vld [vmem:[#allocation5 + $0x2c4] sm:$0xf0]  ;;  %v1363_v22 = vor.u32 %v1603_v15, %v1362_v14 }
  0x37   :  { %759 = vmatpush.bf16.msrb.mxu0 %v1387_v43  ;;  %741 = vmatmul.bf16.vlgmr.msra.gmra.mxu2 %v1833_v52  ;;  %v1111_v23 = vor.u32 %v1538_v16, %v1108_v17  ;;  %v1554_v24 = vld [vmem:[#allocation5 + $0xc4] sm:$0xf]  ;;  %v1172_v25 = vld [vmem:[#allocation5 + $0xc8] sm:$0xf0]  ;;  %v1354_v26 = vld [vmem:[#allocation5 + $0x230] sm:$0xf]  ;;  %v1427_v30 = vor.u32 %v1619_v21, %v1426_v20 }
  0x38   :  { %792 = vmatpush.bf16.msrb.mxu2 %v1459_v50  ;;  %754 = vmatmul.bf16.vlgmr.msra.gmra.mxu3 %v1837_v4  ;;  %v1601_v27 = vld [vmem:[#allocation5 + $0x234] sm:$0xf0]  ;;  %v1536_v28 = vld [vmem:[#allocation5 + $0x34] sm:$0xf]  ;;  %v1100_v29 = vld [vmem:[#allocation5 + $0x38] sm:$0xf0]  ;;  %v1175_v32 = vor.u32 %v1554_v24, %v1172_v25 }
  0x39   :  { %798 = vmatpush.bf16.msrb.mxu3 %v1135_v44  ;;  %728 = vmatmul.bf16.vlgmr.msra.gmra.mxu1 %v1839_v5  ;;  %v1418_v31 = vld [vmem:[#allocation5 + $0x2b0] sm:$0xf]  ;;  %v1617_v33 = vld [vmem:[#allocation5 + $0x2b4] sm:$0xf0]  ;;  %v1552_v34 = vld [vmem:[#allocation5 + $0xb4] sm:$0xf]  ;;  %v1355_v36 = vor.u32 %v1601_v27, %v1354_v26  ;;  %v1103_v37 = vor.u32 %v1536_v28, %v1100_v29 }
  0x3a   :  { %772 = vmatpush.bf16.msrb.mxu1 %v1451_v53  ;;  %v82_v35 = vld [vmem:[#allocation2 + $0x8] sm:$0x3f]  ;;  %v1346_v39 = vld [vmem:[#allocation5 + $0x220] sm:$0xf]  ;;  %v1599_v40 = vld [vmem:[#allocation5 + $0x224] sm:$0xf0]  ;;  %v1419_v43 = vor.u32 %v1617_v33, %v1418_v31 }
  0x3b   :  { %760 = vmatpush.bf16.msrb.mxu0 %v1379_v60  ;;  %v1164_v38 = vld [vmem:[#allocation5 + $0xb8] sm:$0xf0]  ;;  %87 = vst [vmem:[#allocation1 + $0x20] ss:$4 sm:$0xff] %v82_v35  ;;  %v1534_v41 = vld [vmem:[#allocation5 + $0x24] sm:$0xf]  ;;  %v1347_v48 = vor.u32 %v1599_v40, %v1346_v39 }
  0x3c   :  { %811 = vmatpush.bf16.msra.mxu2 %v1199_v56  ;;  %v1092_v42 = vld [vmem:[#allocation5 + $0x28] sm:$0xf0]  ;;  %v1167_v44 = vor.u32 %v1552_v34, %v1164_v38  ;;  %v1410_v45 = vld [vmem:[#allocation5 + $0x2a0] sm:$0xf]  ;;  %v1615_v46 = vld [vmem:[#allocation5 + $0x2a4] sm:$0xf0] }
  0x3d   :  { %799 = vmatpush.bf16.msrb.mxu3 %v1127_v61  ;;  %v1550_v47 = vld [vmem:[#allocation5 + $0xa4] sm:$0xf]  ;;  %v1095_v49 = vor.u32 %v1534_v41, %v1092_v42  ;;  %v1156_v50 = vld [vmem:[#allocation5 + $0xa8] sm:$0xf0]  ;;  %v1338_v51 = vld [vmem:[#allocation5 + $0x210] sm:$0xf]  ;;  %v1411_v57 = vor.u32 %v1615_v46, %v1410_v45 }
  0x3e   :  { %773 = vmatpush.bf16.msrb.mxu1 %v1443_v6  ;;  %v1597_v53 = vld [vmem:[#allocation5 + $0x214] sm:$0xf0]  ;;  %v1532_v54 = vld [vmem:[#allocation5 + $0x14] sm:$0xf]  ;;  %v1084_v55 = vld [vmem:[#allocation5 + $0x18] sm:$0xf0]  ;;  %v1159_v62 = vor.u32 %v1550_v47, %v1156_v50 }
  0x3f   :  { %761 = vmatpush.bf16.msrb.mxu0 %v1371_v10  ;;  %v1402_v56 = vld [vmem:[#allocation5 + $0x290] sm:$0xf]  ;;  %v1613_v59 = vld [vmem:[#allocation5 + $0x294] sm:$0xf0]  ;;  %v1548_v60 = vld [vmem:[#allocation5 + $0x94] sm:$0xf]  ;;  %v1339_v1 = vor.u32 %v1597_v53, %v1338_v51  ;;  %v1087_v2 = vor.u32 %v1532_v54, %v1084_v55 }
  0x40   :  { %812 = vmatpush.bf16.msra.mxu2 %v1191_v7  ;;  %v1148_v61 = vld [vmem:[#allocation5 + $0x98] sm:$0xf0]  ;;  %v1330_v63 = vld [vmem:[#allocation5 + $0x200] sm:$0xf]  ;;  %v1595_v3 = vld [vmem:[#allocation5 + $0x204] sm:$0xf0]  ;;  %v1403_v12 = vor.u32 %v1613_v59, %v1402_v56 }
  0x41   :  { %800 = vmatpush.bf16.msrb.mxu3 %v1119_v11  ;;  %v1530_v7 = vld [vmem:[#allocation5 + $0x4] sm:$0xf]  ;;  %v1076_v8 = vld [vmem:[#allocation5 + $0x8] sm:$0xf0]  ;;  %v1576_v9 = vld [vmem:[#allocation5 + $0x174] sm:$0xf]  ;;  %v1151_v16 = vor.u32 %v1548_v60, %v1148_v61  ;;  %v1331_v20 = vor.u32 %v1595_v3, %v1330_v63 }
  0x42   :  { %774 = vmatpush.bf16.msrb.mxu1 %v1435_v18  ;;  %v94_v0 = vld.sshfl [vmem:[#allocation1 + $0x30] sm:$0xff pattern:$0x73625140]  ;;  %v1608_v11 = vld [vmem:[#allocation5 + $0x274] sm:$0xf]  ;;  %v1079_v21 = vor.u32 %v1530_v7, %v1076_v8  ;;  %s1790_s15 = smov [#allocation10]  }
  0x43   :  { %762 = vmatpush.bf16.msrb.mxu0 %v1363_v22  ;;  %v1845_v6 = vpack.c.bf16 %v94_v0, %v94_v0  ;;  %v1260_v10 = vld [vmem:[#allocation5 + $0x178] sm:$0xf0]  ;;  %v1394_v14 = vld [vmem:[#allocation5 + $0x280] sm:$0xf]  ;;  %v1611_v15 = vld [vmem:[#allocation5 + $0x284] sm:$0xf0] }
  0x44   :  { %813 = vmatpush.bf16.msra.mxu2 %v1183_v19  ;;  %v1388_v13 = vld [vmem:[#allocation5 + $0x278] sm:$0xf0]  ;;  %v1546_v17 = vld [vmem:[#allocation5 + $0x84] sm:$0xf]  ;;  %v1140_v18 = vld [vmem:[#allocation5 + $0x88] sm:$0xf0]  ;;  %v1263_v24 = vor.u32 %v1576_v9, %v1260_v10  ;;  %v1395_v29 = vor.u32 %v1611_v15, %v1394_v14 }
  0x45   :  { %801 = vmatpush.bf16.msrb.mxu3 %v1111_v23  ;;  %v1592_v19 = vld [vmem:[#allocation5 + $0x1f4] sm:$0xf]  ;;  %v92_v22 = vld.sshfl [vmem:[#allocation1 + $0x20] sm:$0xff pattern:$0x73625140]  ;;  %v1391_v25 = vor.u32 %v1608_v11, %v1388_v13  ;;  %v1143_v33 = vor.u32 %v1546_v17, %v1140_v18  ;;  %s1058_s16 = sshll.u32 %s1790_s15, 4  ;;  %s1059_s16 = int_to_ptr.vmem [resolvable:$true] %s1058_s16 }
  0x46   :  { %775 = vmatpush.bf16.msrb.mxu1 %v1427_v30  ;;  %v1324_v23 = vld [vmem:[#allocation5 + $0x1f8] sm:$0xf0]  ;;  %v1624_v26 = vld [vmem:[#allocation5 + $0x2f4] sm:$0xf]  ;;  %v1574_v28 = vld [vmem:[#allocation5 + $0x164] sm:$0xf] }
  0x47   :  { %763 = vmatpush.bf16.msrb.mxu0 %v1355_v36  ;;  %1464 = vmatmul.msk.bf16.vlgmr.msrb.gmra.mxu2 %vm703_vm0, %v1845_v6  ;;  %v1452_v27 = vld [vmem:[#allocation5 + $0x2f8] sm:$0xf0]  ;;  %v93_v30 = vld.sshfl [vmem:[#allocation1 + $0x28] sm:$0xff pattern:$0x73625140]  ;;  %v1327_v36 = vor.u32 %v1592_v19, %v1324_v23  ;;  %s1060_s19 = sshll.u32 %s1874_s5, 4  ;;  %s1061_s19 = int_to_ptr.hbm [resolvable:$true] %s1060_s19 }
  0x48   :  { %814 = vmatpush.bf16.msra.mxu2 %v1175_v32  ;;  %v1252_v31 = vld [vmem:[#allocation5 + $0x168] sm:$0xf0]  ;;  %v1849_v32 = vpack.c.bf16 %v92_v22, %v92_v22  ;;  %v1606_v34 = vld [vmem:[#allocation5 + $0x264] sm:$0xf]  ;;  %v1851_v39 = vpack.c.bf16 %v93_v30, %v93_v30  ;;  %v1572_v45 = vld [vmem:[#allocation5 + $0x154] sm:$0xf] }
  0x49   :  { %802 = vmatpush.bf16.msrb.mxu3 %v1103_v37  ;;  %v1380_v35 = vld [vmem:[#allocation5 + $0x268] sm:$0xf0]  ;;  %v1455_v37 = vor.u32 %v1624_v26, %v1452_v27  ;;  %v1590_v38 = vld [vmem:[#allocation5 + $0x1e4] sm:$0xf]  ;;  %v1255_v40 = vor.u32 %v1574_v28, %v1252_v31  ;;  %v1244_v46 = vld [vmem:[#allocation5 + $0x158] sm:$0xf0] }
  0x4a   :  { %776 = vmatpush.bf16.msrb.mxu1 %v1419_v43  ;;  %v1316_v41 = vld [vmem:[#allocation5 + $0x1e8] sm:$0xf0]  ;;  %v1622_v42 = vld [vmem:[#allocation5 + $0x2e4] sm:$0xf]  ;;  %v1604_v47 = vld [vmem:[#allocation5 + $0x254] sm:$0xf]  ;;  %v1247_v53 = vor.u32 %v1572_v45, %v1244_v46 }
  0x4b   :  { %764 = vmatpush.bf16.msrb.mxu0 %v1347_v48  ;;  %v1444_v43 = vld [vmem:[#allocation5 + $0x2e8] sm:$0xf0]  ;;  %v1372_v48 = vld [vmem:[#allocation5 + $0x258] sm:$0xf0]  ;;  %v1588_v51 = vld [vmem:[#allocation5 + $0x1d4] sm:$0xf] }
  0x4c   :  { %815 = vmatpush.bf16.msra.mxu2 %v1167_v44  ;;  %v1383_v44 = vor.u32 %v1606_v34, %v1380_v35  ;;  %v1447_v50 = vor.u32 %v1622_v42, %v1444_v43  ;;  %v1308_v54 = vld [vmem:[#allocation5 + $0x1d8] sm:$0xf0]  ;;  %v1620_v55 = vld [vmem:[#allocation5 + $0x2d4] sm:$0xf]  ;;  %v1570_v59 = vld [vmem:[#allocation5 + $0x144] sm:$0xf] }
  0x4d   :  { %803 = vmatpush.bf16.msrb.mxu3 %v1095_v49  ;;  %v1319_v49 = vor.u32 %v1590_v38, %v1316_v41  ;;  %v1436_v56 = vld [vmem:[#allocation5 + $0x2d8] sm:$0xf0]  ;;  %v1236_v60 = vld [vmem:[#allocation5 + $0x148] sm:$0xf0]  ;;  %v1602_v61 = vld [vmem:[#allocation5 + $0x244] sm:$0xf]  ;;  %v1311_v63 = vor.u32 %v1588_v51, %v1308_v54 }
  0x4e   :  { %777 = vmatpush.bf16.msrb.mxu1 %v1411_v57  ;;  %v1375_v57 = vor.u32 %v1604_v47, %v1372_v48  ;;  %v1439_v0 = vor.u32 %v1620_v55, %v1436_v56  ;;  %v1239_v3 = vor.u32 %v1570_v59, %v1236_v60  ;;  %v1618_v7 = vld [vmem:[#allocation5 + $0x2c4] sm:$0xf]  ;;  %v1428_v8 = vld [vmem:[#allocation5 + $0x2c8] sm:$0xf0]  ;;  %v1568_v10 = vld [vmem:[#allocation5 + $0x134] sm:$0xf] }
  0x4f   :  { %765 = vmatpush.bf16.msrb.mxu0 %v1339_v1  ;;  %v1586_v1 = vld [vmem:[#allocation5 + $0x1c4] sm:$0xf]  ;;  %v1228_v11 = vld [vmem:[#allocation5 + $0x138] sm:$0xf0]  ;;  %v1431_v14 = vor.u32 %v1618_v7, %v1428_v8  ;;  %v1584_v15 = vld [vmem:[#allocation5 + $0x1b4] sm:$0xf] }
  0x50   :  { %816 = vmatpush.bf16.msra.mxu2 %v1159_v62  ;;  %v1364_v62 = vld [vmem:[#allocation5 + $0x248] sm:$0xf0]  ;;  %v1356_v13 = vld [vmem:[#allocation5 + $0x238] sm:$0xf0]  ;;  %v1616_v18 = vld [vmem:[#allocation5 + $0x2b4] sm:$0xf] }
  0x51   :  { %804 = vmatpush.bf16.msrb.mxu3 %v1087_v2  ;;  %v1300_v2 = vld [vmem:[#allocation5 + $0x1c8] sm:$0xf0]  ;;  %v1367_v9 = vor.u32 %v1602_v61, %v1364_v62  ;;  %v1292_v17 = vld [vmem:[#allocation5 + $0x1b8] sm:$0xf0]  ;;  %v1598_v23 = vld [vmem:[#allocation5 + $0x224] sm:$0xf] }
  0x52   :  { %778 = vmatpush.bf16.msrb.mxu1 %v1403_v12  ;;  %v1600_v12 = vld [vmem:[#allocation5 + $0x234] sm:$0xf]  ;;  %v1420_v19 = vld [vmem:[#allocation5 + $0x2b8] sm:$0xf0]  ;;  %v1220_v22 = vld [vmem:[#allocation5 + $0x128] sm:$0xf0] }
  0x53   :  { %766 = vmatpush.bf16.msrb.mxu0 %v1331_v20  ;;  %v1359_v20 = vor.u32 %v1600_v12, %v1356_v13  ;;  %v1582_v26 = vld [vmem:[#allocation5 + $0x1a4] sm:$0xf]  ;;  %v1284_v28 = vld [vmem:[#allocation5 + $0x1a8] sm:$0xf0]  ;;  %v1212_v34 = vld [vmem:[#allocation5 + $0x118] sm:$0xf0] }
  0x54   :  { %817 = vmatpush.bf16.msra.mxu2 %v1151_v16  ;;  %v1231_v16 = vor.u32 %v1568_v10, %v1228_v11  ;;  %v1412_v30 = vld [vmem:[#allocation5 + $0x2a8] sm:$0xf0]  ;;  %v1596_v35 = vld [vmem:[#allocation5 + $0x214] sm:$0xf]  ;;  %v1276_v42 = vld [vmem:[#allocation5 + $0x198] sm:$0xf0] }
  0x55   :  { %805 = vmatpush.bf16.msrb.mxu3 %v1079_v21  ;;  %v1566_v21 = vld [vmem:[#allocation5 + $0x124] sm:$0xf]  ;;  %v1612_v43 = vld [vmem:[#allocation5 + $0x294] sm:$0xf]  ;;  %v1204_v47 = vld [vmem:[#allocation5 + $0x108] sm:$0xf0] }
  0x56   :  { %779 = vmatpush.bf16.msrb.mxu1 %v1395_v29  ;;  %767 = vmatmul.bf16.vlgmr.msrb.gmra.mxu0 %v1849_v32  ;;  %v1223_v27 = vor.u32 %v1566_v21, %v1220_v22  ;;  %v1614_v29 = vld [vmem:[#allocation5 + $0x2a4] sm:$0xf]  ;;  %v1460_v51 = vld [vmem:[#allocation5 + $0x308] sm:$0xf0]  ;;  %v1632_v7 = vld [vmem:[#allocation8 + $0x20] sm:$0xff] }
  0x57   :  { %824 = vmatpush.bf16.msra.mxu0 %v1263_v24  ;;  %v1295_v24 = vor.u32 %v1584_v15, %v1292_v17  ;;  %v1415_v38 = vor.u32 %v1614_v29, %v1412_v30  ;;  %v1562_v46 = vld [vmem:[#allocation5 + $0x104] sm:$0xf]  ;;  %v1396_v61 = vld [vmem:[#allocation5 + $0x288] sm:$0xf0]  ;;  %v1641_v21 = vld [vmem:[#allocation8 + $0x68] sm:$0xff] }
  0x58   :  { %818 = vmatpush.bf16.msra.mxu2 %v1143_v33  ;;  %806 = vmatmul.bf16.vlgmr.msrb.gmra.mxu3 %v1835_v58  ;;  %v1303_v58 = vor.u32 %v1586_v1, %v1300_v2  ;;  %v1564_v33 = vld [vmem:[#allocation5 + $0x114] sm:$0xf]  ;;  %v1594_v48 = vld [vmem:[#allocation5 + $0x204] sm:$0xf]  ;;  %v1207_v55 = vor.u32 %v1562_v46, %v1204_v47  ;;  %v1635_v1 = vld [vmem:[#allocation8 + $0x38] sm:$0xff] }
  0x59   :  { %850 = vmatpush.bf16.msra.mxu3 %v1391_v25  ;;  %780 = vmatmul.bf16.vlgmr.msrb.gmra.mxu1 %v1851_v39  ;;  %v1423_v25 = vor.u32 %v1616_v18, %v1420_v19  ;;  %v1215_v41 = vor.u32 %v1564_v33, %v1212_v34  ;;  %v1578_v56 = vld [vmem:[#allocation5 + $0x184] sm:$0xf]  ;;  %v1631_v8 = vld [vmem:[#allocation8 + $0x18] sm:$0xff] }
  0x5a   :  { %837 = vmatpush.bf16.msra.mxu1 %v1327_v36  ;;  %v1340_v36 = vld [vmem:[#allocation5 + $0x218] sm:$0xf0]  ;;  %v1610_v60 = vld [vmem:[#allocation5 + $0x284] sm:$0xf] }
  0x5b   :  { %825 = vmatpush.bf16.msra.mxu0 %v1255_v40  ;;  %819 = vmatmul.bf16.vlgmr.msra.gmra.mxu2 %v1839_v5  ;;  %v1348_v5 = vld [vmem:[#allocation5 + $0x228] sm:$0xf0]  ;;  %v1580_v40 = vld [vmem:[#allocation5 + $0x194] sm:$0xf]  ;;  %v1343_v45 = vor.u32 %v1596_v35, %v1340_v36  ;;  %v1634_v2 = vld [vmem:[#allocation8 + $0x30] sm:$0xff] }
  0x5c   :  { %863 = vmatpush.bf16.msrb.mxu2 %v1455_v37  ;;  %v1351_v31 = vor.u32 %v1598_v23, %v1348_v5  ;;  %v1287_v37 = vor.u32 %v1582_v26, %v1284_v28  ;;  %v1639_v28 = vld [vmem:[#allocation8 + $0x58] sm:$0xff]  ;;  %v1638_v34 = vld [vmem:[#allocation8 + $0x50] sm:$0xff] }
  0x5d   :  { %851 = vmatpush.bf16.msra.mxu3 %v1383_v44  ;;  %v1404_v44 = vld [vmem:[#allocation5 + $0x298] sm:$0xf0] }
  0x5e   :  { %838 = vmatpush.bf16.msra.mxu1 %v1319_v49  ;;  %v1332_v49 = vld [vmem:[#allocation5 + $0x208] sm:$0xf0]  ;;  %v1407_v54 = vor.u32 %v1612_v43, %v1404_v44 }
  0x5f   :  { %826 = vmatpush.bf16.msra.mxu0 %v1247_v53  ;;  %v1279_v53 = vor.u32 %v1580_v40, %v1276_v42  ;;  %v1335_v59 = vor.u32 %v1594_v48, %v1332_v49 }
  0x60   :  { %864 = vmatpush.bf16.msrb.mxu2 %v1447_v50  ;;  %v1626_v50 = vld [vmem:[#allocation5 + $0x304] sm:$0xf] }
  0x61   :  { %852 = vmatpush.bf16.msra.mxu3 %v1375_v57  ;;  %v1268_v57 = vld [vmem:[#allocation5 + $0x188] sm:$0xf0]  ;;  %v1463_v62 = vor.u32 %v1626_v50, %v1460_v51 }
  0x62   :  { %839 = vmatpush.bf16.msra.mxu1 %v1311_v63  ;;  %v1271_v63 = vor.u32 %v1578_v56, %v1268_v57 }
  0x63   :  { %827 = vmatpush.bf16.msra.mxu0 %v1239_v3  ;;  %v1633_v3 = vld [vmem:[#allocation8 + $0x28] sm:$0xff] }
  0x64   :  { %865 = vmatpush.bf16.msrb.mxu2 %v1439_v0  ;;  %v1399_v0 = vor.u32 %v1610_v60, %v1396_v61 }
  0x65   :  { %853 = vmatpush.bf16.msra.mxu3 %v1367_v9 }
  0x66   :  { %840 = vmatpush.bf16.msra.mxu1 %v1303_v58  ;;  %v1643_v58 = vld [vmem:[#allocation8 + $0x78] sm:$0xff] }
  0x67   :  { %828 = vmatpush.bf16.msra.mxu0 %v1231_v16  ;;  %v1642_v16 = vld [vmem:[#allocation8 + $0x70] sm:$0xff] }
  0x68   :  { %866 = vmatpush.bf16.msrb.mxu2 %v1431_v14 }
  0x69   :  { %854 = vmatpush.bf16.msra.mxu3 %v1359_v20 }
  0x6a   :  { %841 = vmatpush.bf16.msra.mxu1 %v1295_v24  ;;  %v1640_v24 = vld [vmem:[#allocation8 + $0x60] sm:$0xff] }
  0x6b   :  { %829 = vmatpush.bf16.msra.mxu0 %v1223_v27 }
  0x6c   :  { %867 = vmatpush.bf16.msrb.mxu2 %v1423_v25 }
  0x6d   :  { %855 = vmatpush.bf16.msra.mxu3 %v1351_v31 }
  0x6e   :  { %842 = vmatpush.bf16.msra.mxu1 %v1287_v37 }
  0x6f   :  { %830 = vmatpush.bf16.msra.mxu0 %v1215_v41  ;;  %v1636_v41 = vld [vmem:[#allocation8 + $0x40] sm:$0xff] }
  0x70   :  { %868 = vmatpush.bf16.msrb.mxu2 %v1415_v38  ;;  %v1637_v38 = vld [vmem:[#allocation8 + $0x48] sm:$0xff] }
  0x71   :  { %856 = vmatpush.bf16.msra.mxu3 %v1343_v45 }
  0x72   :  { %843 = vmatpush.bf16.msra.mxu1 %v1279_v53 }
  0x73   :  { %831 = vmatpush.bf16.msra.mxu0 %v1207_v55 }
  0x74   :  { %869 = vmatpush.bf16.msrb.mxu2 %v1407_v54 }
  0x75   :  { %857 = vmatpush.bf16.msra.mxu3 %v1335_v59 }
  0x76   :  { %844 = vmatpush.bf16.msra.mxu1 %v1271_v63  ;;  %832 = vmatmul.bf16.vlgmr.msra.gmra.mxu0 %v1833_v52  ;;  %v1630_v52 = vld [vmem:[#allocation8 + $0x10] sm:$0xff] }
  0x77   :  { %883 = vmatpush.bf16.msrb.mxu0 %v1463_v62 }
  0x78   :  { %858 = vmatmul.bf16.vlgmr.msra.gmra.mxu3 %v1849_v32  ;;  %870 = vmatpush.bf16.msrb.mxu2 %v1399_v0  ;;  %v1629_v32 = vld [vmem:[#allocation8 + $0x8] sm:$0xff] }
  0x79   :  { %845 = vmatmul.bf16.vlgmr.msra.gmra.mxu1 %v1837_v4  ;;  %1038 = vmatpush.bf16.msrb.mxu3 %v1643_v58 }
  0x7a   :  { %1025 = vmatpush.bf16.msrb.mxu1 %v1635_v1 }
  0x7b   :  { %871 = vmatmul.bf16.vlgmr.msrb.gmra.mxu2 %v1851_v39  ;;  %v1628_v39 = vld [vmem:[#allocation8] sm:$0xff] }
  0x7d   :  { %1039 = vmatpush.bf16.msrb.mxu3 %v1642_v16 }
  0x7e   :  { %1026 = vmatpush.bf16.msrb.mxu1 %v1634_v2 }
  0x81   :  { %1040 = vmatpush.bf16.msrb.mxu3 %v1641_v21 }
  0x82   :  { %1027 = vmatpush.bf16.msrb.mxu1 %v1633_v3 }
  0x85   :  { %1041 = vmatpush.bf16.msrb.mxu3 %v1640_v24 }
  0x86   :  { %1465 = vmatmul.msk.bf16.vlgmr.msrb.gmra.mxu0 %vm703_vm0, %v1845_v6  ;;  %1028 = vmatpush.bf16.msrb.mxu1 %v1632_v7  ;;  %v207_v6 = vld [vmem:[#allocation7] sm:$0x3]  ;;  %v1653_v7 = vld [vmem:[%s1873_s4] ss:$0 sm:$0xff] }
  0x87   :  { %v209_v14 = vperm.slane %v207_v6, 0  ;;  %v210_v44 = vperm.slane %v207_v6, 1 }
  0x89   :  { %1042 = vmatpush.bf16.msrb.mxu3 %v1639_v28 }
  0x8a   :  { %1029 = vmatpush.bf16.msrb.mxu1 %v1631_v8 }
  0x8d   :  { %1043 = vmatpush.bf16.msrb.mxu3 %v1638_v34 }
  0x8e   :  { %1030 = vmatpush.bf16.msrb.mxu1 %v1630_v52 }
  0x91   :  { %1044 = vmatpush.bf16.msrb.mxu3 %v1637_v38 }
  0x92   :  { %1031 = vmatpush.bf16.msrb.mxu1 %v1629_v32 }
  0x95   :  { %1045 = vmatpush.bf16.msrb.mxu3 %v1636_v41 }
  0x96   :  { %1032 = vmatpush.bf16.msrb.mxu1 %v1628_v39 }
  0xb3   :  { %v716_v9 = vpop.f32.mrf.mxu0 }
  0xb4   :  { %v717_v17 = vadd.f32 %v716_v9, %v209_v14 }
  0xb6   :  { %v729_v4 = vpop.f32.mrf.mxu1 }
  0xb7   :  { %v730_v19 = vadd.f32 %v729_v4, %v717_v17 }
  0xba   :  { %v742_v10 = vpop.f32.mrf.mxu2 }
  0xbb   :  { %v755_v11 = vpop.f32.mrf.mxu3  ;;  %v718_v12 = vpop.f32.mrf.mxu0  ;;  %v743_v20 = vadd.f32 %v742_v10, %v730_v19 }
  0xbd   :  { %v756_v23 = vadd.f32 %v755_v11, %v743_v20 }
  0xbe   :  { %v731_v13 = vpop.f32.mrf.mxu1 }
  0xc2   :  { %v744_v15 = vpop.f32.mrf.mxu2 }
  0xc3   :  { %v757_v18 = vpop.f32.mrf.mxu3 }
  0xca   :  { %v794_v22 = vpop.f32.mrf.mxu2 }
  0xd2   :  { %v796_v30 = vpop.f32.mrf.mxu2 }
  0xd3   :  { %v768_v5 = vpop.f32.mrf.mxu0 }
  0xd4   :  { %v769_v25 = vadd.f32 %v768_v5, %v756_v23 }
  0xd6   :  { %v781_v26 = vpop.f32.mrf.mxu1 }
  0xd7   :  { %v782_v27 = vadd.f32 %v781_v26, %v769_v25 }
  0xd9   :  { %v795_v29 = vadd.f32 %v794_v22, %v782_v27 }
  0xdb   :  { %v889_v31 = vmax.f32 %v795_v29, 0.0  ;;  %v770_v33 = vpop.f32.mrf.mxu0  ;;  %v807_v36 = vpop.f32.mrf.mxu3 }
  0xdc   :  { %v808_v45 = vadd.f32 %v807_v36, %v210_v44 }
  0xdd   :  { %v891_v35 = vpack.c.bf16 %v889_v31, %v889_v31 }
  0xde   :  { %v783_v37 = vpop.f32.mrf.mxu1  ;;  %v820_v40 = vpop.f32.mrf.mxu2 }
  0xdf   :  { %1033 = vmatmul.bf16.vlgmr.msrb.gmra.mxu1 %v891_v35  ;;  %v821_v47 = vadd.f32 %v820_v40, %v808_v45 }
  0xe3   :  { %v809_v42 = vpop.f32.mrf.mxu3 }
  0xe6   :  { %v822_v43 = vpop.f32.mrf.mxu2 }
  0xf3   :  { %v833_v46 = vpop.f32.mrf.mxu0 }
  0xf4   :  { %v834_v49 = vadd.f32 %v833_v46, %v821_v47 }
  0xf6   :  { %v846_v48 = vpop.f32.mrf.mxu1 }
  0xf7   :  { %v847_v53 = vadd.f32 %v846_v48, %v834_v49 }
  0xfb   :  { %v859_v50 = vpop.f32.mrf.mxu3  ;;  %v835_v51 = vpop.f32.mrf.mxu0 }
  0xfc   :  { %v860_v55 = vadd.f32 %v859_v50, %v847_v53 }
  0xfe   :  { %v872_v54 = vpop.f32.mrf.mxu2  ;;  %v848_v56 = vpop.f32.mrf.mxu1 }
  0xff   :  { %v873_v57 = vadd.f32 %v872_v54, %v860_v55 }
 0x103   :  { %v861_v59 = vpop.f32.mrf.mxu3  ;;  %v885_v60 = vpop.f32.mrf.mxu0 }
 0x104   :  { %v886_v61 = vadd.f32 %v885_v60, %v873_v57 }
 0x106   :  { %v874_v62 = vpop.f32.mrf.mxu2  ;;  %v890_v63 = vmax.f32 %v886_v61, 0.0 }
 0x108   :  { %v892_v0 = vpack.c.bf16 %v890_v63, %v890_v63 }
 0x10a   :  { %1046 = vmatmul.bf16.vlgmr.msrb.gmra.mxu3 %v892_v0 }
 0x10b   :  { %v887_v1 = vpop.f32.mrf.mxu0 }
 0x15c   :  { %v1034_v2 = vpop.f32.mrf.mxu1 }
 0x15d   :  { %v1035_v8 = vadd.f32 %v1653_v7, %v1034_v2 }
 0x164   :  { %v1036_v3 = vpop.f32.mrf.mxu1 }
 0x18d   :  { %v1047_v52 = vpop.f32.mrf.mxu3 }
 0x18e   :  { %v1048_v32 = vadd.f32 %v1047_v52, %v1035_v8 }
 0x190   :  { %v1051_v9 = vpack.c.bf16 %v1048_v32, %v1048_v32 }
 0x192   :  { %1052 = vst [vmem:[#allocation10] sm:$0x1] %v1051_v9 }
 0x193   :  { %1063 = dma.vmem_to_hbm [thread:$0]  %s1059_s16, 16, %s1061_s19, [#allocation4]  }
 0x195   :  { %v1049_v4 = vpop.f32.mrf.mxu3 }
 0x196   :  { %1780 = dma.done.wait [#allocation4], 16  }
 0x197   :  { %1781 = vsyncadd [#allocation4], 4294967280 }
 0x198   :  { %1068 = vsyncpa [#allocation3], 1 }
 0x199   :  { %1069 = vsyncpa [#allocation6], 1 }
 0x19a   :  { %1070 = vsyncpa [#allocation9], 1 }
 0x19b   :  { %1071 = vsyncpa [#allocation4], 1 }

</bundles_post_ra>
